<compile_context>
chip_gen: v7x
topology: tpu7x:2x2x1
jax: 0.10.0
libtpu: 0.0.40
codegen_flags: <defaults>
</compile_context>

<pallas_src>
import jax
import jax.numpy as jnp
from jax.experimental import pallas as pl
from jax.experimental.pallas import tpu as pltpu


# ---------------------------------------------------------------------------
# Fused multi-layer GCN kernel
# ---------------------------------------------------------------------------
def _fused_gcn_kernel(a_ref, x_ref, w_ref, b_ref, o_ref, h_ref):
    layer = pl.program_id(0)
    n_layers = pl.num_programs(0)

    # Load the (padded) input features into the resident H scratch once.
    @pl.when(layer == 0)
    def _():
        h_ref[...] = x_ref[...]

    # Linear transform: H @ W_l   (bf16 MXU inputs, f32 accumulation).
    xw = jnp.dot(h_ref[...].astype(jnp.bfloat16), w_ref[0],
                 preferred_element_type=jnp.float32)
    # Normalized aggregation + bias: A_hat @ (H W_l) + b_l  (BN already folded).
    h = jnp.dot(a_ref[...], xw.astype(jnp.bfloat16),
                preferred_element_type=jnp.float32) + b_ref[0]

    # ReLU on every layer except the last; dropout is identity (p=0 / eval).
    @pl.when(layer != n_layers - 1)
    def _():
        h_ref[...] = jnp.maximum(h, 0.0)

    @pl.when(layer == n_layers - 1)
    def _():
        o_ref[...] = h


def fused_gcn(a_hat, x_pad, w_all, b_all):
    n_pad = a_hat.shape[0]
    c_pad = w_all.shape[-1]
    n_conv = w_all.shape[0]
    return pl.pallas_call(
        _fused_gcn_kernel,
        out_shape=jax.ShapeDtypeStruct((n_pad, c_pad), jnp.float32),
        grid=(n_conv,),
        in_specs=[
            pl.BlockSpec((n_pad, n_pad), lambda l: (0, 0)),        # A_hat (resident, bf16)
            pl.BlockSpec((n_pad, c_pad), lambda l: (0, 0)),        # X     (resident, f32)
            pl.BlockSpec((1, c_pad, c_pad), lambda l: (l, 0, 0)),  # W_l   (streamed, bf16)
            pl.BlockSpec((1, 1, c_pad), lambda l: (l, 0, 0)),      # b_l   (streamed, f32)
        ],
        out_specs=pl.BlockSpec((n_pad, c_pad), lambda l: (0, 0)),
        scratch_shapes=[pltpu.VMEM((n_pad, c_pad), jnp.float32)],   # H carried across layers
        compiler_params=pltpu.CompilerParams(
            # The layer axis carries H and the output block, so it is sequential.
            dimension_semantics=("arbitrary",),
        ),
    )(a_hat, x_pad, w_all, b_all)


# ---------------------------------------------------------------------------
# Host-side glue (graph normalization, BN folding, padding)
# ---------------------------------------------------------------------------
def _round_up(v, m):
    return (v + m - 1) // m * m


def _pad2(x, rows, cols):
    return jnp.pad(x, ((0, rows - x.shape[0]), (0, cols - x.shape[1])))


def build_normalized_adjacency(edge_index, num_nodes):
    """Dense A_hat = D^{-1/2} (A + I) D^{-1/2}, matching PyG gcn_norm with
    add_self_loops=True: duplicate (non-self-loop) edges sum, existing self
    loops are replaced by a single weight-1 self loop per node."""
    src, dst = edge_index[0], edge_index[1]
    not_self = (src != dst).astype(jnp.float32)
    a = jnp.zeros((num_nodes, num_nodes), jnp.float32)
    a = a.at[dst, src].add(not_self)              # message src -> dst; duplicates sum
    idx = jnp.arange(num_nodes)
    a = a.at[idx, idx].set(1.0)                   # one self loop per node (fill value 1)
    deg = a.sum(axis=1)                           # in-degree incl. self loop
    dinv = jnp.where(deg > 0, jax.lax.rsqrt(deg), 0.0)
    return dinv[:, None] * a * dinv[None, :]


def init_gcn_params(key, in_channels, hidden_channels, out_channels, num_layers=5):
    """Deterministic (glorot-uniform) parameter init matching GCN.__init__ shapes.
    Each layer: (W, bias, bn_gamma, bn_beta, bn_running_mean, bn_running_var)."""
    dims = (
        [(in_channels, hidden_channels)]
        + [(hidden_channels, hidden_channels)] * (num_layers - 1)
        + [(hidden_channels, out_channels)]
    )
    params = []
    for cin, cout in dims:
        key, k = jax.random.split(key)
        limit = (6.0 / (cin + cout)) ** 0.5
        w = jax.random.uniform(k, (cin, cout), jnp.float32, -limit, limit)
        b = jnp.zeros((cout,), jnp.float32)       # GCNConv bias (init zeros)
        gamma = jnp.ones((cout,), jnp.float32)    # BatchNorm1d weight
        beta = jnp.zeros((cout,), jnp.float32)    # BatchNorm1d bias
        rmean = jnp.zeros((cout,), jnp.float32)   # BatchNorm1d running_mean
        rvar = jnp.ones((cout,), jnp.float32)     # BatchNorm1d running_var
        params.append((w, b, gamma, beta, rmean, rvar))
    return params


def gcn_forward(x, edge_index, params, use_bn=True, dropout=0.0, bn_eps=1e-5):
    # TODO(synk): dropout is identity here (p=0.0 default / inference mode).
    del dropout
    n, _ = x.shape
    n_conv = len(params)
    c_out = params[-1][0].shape[1]

    c_pad = _round_up(max(max(w.shape) for (w, *_r) in params), 128)
    n_pad = _round_up(n, 128)

    # Fold eval-mode BatchNorm into the conv weight / bias, then pad to 128 lanes.
    ws, bs = [], []
    for li, (w, b, gamma, beta, rmean, rvar) in enumerate(params):
        if use_bn and li < n_conv - 1:            # final conv has no BN
            scale = gamma * jax.lax.rsqrt(rvar + bn_eps)
            w = w * scale[None, :]
            b = (b - rmean) * scale + beta
        ws.append(_pad2(w, c_pad, c_pad).astype(jnp.bfloat16))
        bs.append(jnp.pad(b, (0, c_pad - b.shape[0])).astype(jnp.float32))
    w_all = jnp.stack(ws)                          # (L, C_pad, C_pad) bf16
    b_all = jnp.stack(bs)[:, None, :]              # (L, 1, C_pad)     f32

    a_hat = build_normalized_adjacency(edge_index, n)
    a_hat = _pad2(a_hat, n_pad, n_pad).astype(jnp.bfloat16)
    x_pad = _pad2(x.astype(jnp.float32), n_pad, c_pad)

    out = fused_gcn(a_hat, x_pad, w_all, b_all)
    return out[:n, :c_out]


if __name__ == "__main__":
    key = jax.random.PRNGKey(0)
    k_x, k_e, k_p = jax.random.split(key, 3)

    num_nodes = 16
    in_channels = 8
    hidden_channels = 32
    out_channels = 4
    num_layers = 5
    num_edges = 40

    x = jax.random.normal(k_x, (num_nodes, in_channels), jnp.float32)
    edge_index = jax.random.randint(k_e, (2, num_edges), 0, num_nodes, jnp.int32)

    params = init_gcn_params(k_p, in_channels, hidden_channels, out_channels,
                             num_layers=num_layers)

    out = gcn_forward(x, edge_index, params, use_bn=True, dropout=0.0)
    out = jax.block_until_ready(out)
    assert out.shape == (num_nodes, out_channels)
    assert bool(jnp.all(jnp.isfinite(out)))
    print("KERNEL_OK")
</pallas_src>

<mosaic_0001>
module attributes {stable_mosaic.version = 11 : i64} {
  func.func @_fused_gcn_kernel(%arg0: i32, %arg1: memref<128x128xbf16, #tpu.memory_space<vmem>>, %arg2: memref<128x128xf32, #tpu.memory_space<vmem>>, %arg3: memref<1x128x128xbf16, #tpu.memory_space<vmem>>, %arg4: memref<1x1x128xf32, #tpu.memory_space<vmem>>, %arg5: memref<128x128xf32, #tpu.memory_space<vmem>>, %arg6: memref<128x128xf32, #tpu.memory_space<vmem>>) attributes {dimension_semantics = [#tpu.dimension_semantics<arbitrary>], iteration_bounds = array<i64: 6>, scalar_prefetch = 0 : i64, scratch_operands = 1 : i64, tpu.core_type = #tpu.core_type<tc>, window_params = [{pipeline_mode = #tpu.pipeline_mode<synchronous>, transform_indices = @transform_0, window_bounds = array<i64: 128, 128>}, {pipeline_mode = #tpu.pipeline_mode<synchronous>, transform_indices = @transform_1, window_bounds = array<i64: 128, 128>}, {transform_indices = @transform_2, window_bounds = array<i64: 1, 128, 128>}, {transform_indices = @transform_3, window_bounds = array<i64: 1, 1, 128>}, {pipeline_mode = #tpu.pipeline_mode<synchronous>, transform_indices = @transform_4, window_bounds = array<i64: 128, 128>}]} {
    %c0_i32 = arith.constant 0 : i32
    %0 = arith.cmpi eq, %arg0, %c0_i32 : i32
    %1 = arith.extui %0 : i1 to i32
    %c0_i32_0 = arith.constant 0 : i32
    %2 = arith.cmpi ne, %1, %c0_i32_0 : i32
    scf.if %2 {
      %c0_14 = arith.constant 0 : index
      %c0_15 = arith.constant 0 : index
      %21 = vector.load %arg2[%c0_14, %c0_15] : memref<128x128xf32, #tpu.memory_space<vmem>>, vector<128x128xf32>
      %c0_16 = arith.constant 0 : index
      %c0_17 = arith.constant 0 : index
      %22 = vector.load %arg6[%c0_16, %c0_17] : memref<128x128xf32, #tpu.memory_space<vmem>>, vector<128x128xf32>
      tpu.vector_store %arg6[%c0_16, %c0_17], %21 {strides = array<i32>} : memref<128x128xf32, #tpu.memory_space<vmem>>, vector<128x128xf32>,
    } else {
    }
    %c0 = arith.constant 0 : index
    %c0_1 = arith.constant 0 : index
    %3 = vector.load %arg6[%c0, %c0_1] : memref<128x128xf32, #tpu.memory_space<vmem>>, vector<128x128xf32>
    %4 = arith.truncf %3 : vector<128x128xf32> to vector<128x128xbf16>
    %c0_2 = arith.constant 0 : index
    %c0_3 = arith.constant 0 : index
    %c0_4 = arith.constant 0 : index
    %5 = vector.load %arg3[%c0_2, %c0_3, %c0_4] : memref<1x128x128xbf16, #tpu.memory_space<vmem>>, vector<1x128x128xbf16>
    %6 = vector.shape_cast %5 : vector<1x128x128xbf16> to vector<128x128xbf16>
    %cst = arith.constant dense<0.000000e+00> : vector<128x128xf32>
    %7 = tpu.matmul %4, %6, %cst {dimension_numbers = #tpu.dot_dimension_numbers<[1], [0], [0], [1], [0, 0, 1, 1], [], []>} : vector<128x128xbf16>, vector<128x128xbf16>, vector<128x128xf32> -> vector<128x128xf32>
    %c0_5 = arith.constant 0 : index
    %c0_6 = arith.constant 0 : index
    %8 = vector.load %arg1[%c0_5, %c0_6] : memref<128x128xbf16, #tpu.memory_space<vmem>>, vector<128x128xbf16>
    %9 = arith.truncf %7 : vector<128x128xf32> to vector<128x128xbf16>
    %cst_7 = arith.constant dense<0.000000e+00> : vector<128x128xf32>
    %10 = tpu.matmul %8, %9, %cst_7 {dimension_numbers = #tpu.dot_dimension_numbers<[1], [0], [0], [1], [0, 0, 1, 1], [], []>} : vector<128x128xbf16>, vector<128x128xbf16>, vector<128x128xf32> -> vector<128x128xf32>
    %c0_8 = arith.constant 0 : index
    %c0_9 = arith.constant 0 : index
    %c0_10 = arith.constant 0 : index
    %11 = vector.load %arg4[%c0_8, %c0_9, %c0_10] : memref<1x1x128xf32, #tpu.memory_space<vmem>>, vector<1x1x128xf32>
    %12 = vector.shape_cast %11 : vector<1x1x128xf32> to vector<1x128xf32>
    %13 = vector.broadcast %12 : vector<1x128xf32> to vector<128x128xf32>
    %14 = arith.addf %10, %13 : vector<128x128xf32>
    %c5_i32 = arith.constant 5 : i32
    %15 = arith.cmpi ne, %arg0, %c5_i32 : i32
    %16 = arith.extui %15 : i1 to i32
    %c0_i32_11 = arith.constant 0 : i32
    %17 = arith.cmpi ne, %16, %c0_i32_11 : i32
    scf.if %17 {
      %cst_14 = arith.constant 0.000000e+00 : f32
      %21 = vector.broadcast %cst_14 : f32 to vector<128x128xf32>
      %22 = arith.maximumf %14, %21 : vector<128x128xf32>
      %c0_15 = arith.constant 0 : index
      %c0_16 = arith.constant 0 : index
      %23 = vector.load %arg6[%c0_15, %c0_16] : memref<128x128xf32, #tpu.memory_space<vmem>>, vector<128x128xf32>
      tpu.vector_store %arg6[%c0_15, %c0_16], %22 {strides = array<i32>} : memref<128x128xf32, #tpu.memory_space<vmem>>, vector<128x128xf32>,
    } else {
    }
    %c5_i32_12 = arith.constant 5 : i32
    %18 = arith.cmpi eq, %arg0, %c5_i32_12 : i32
    %19 = arith.extui %18 : i1 to i32
    %c0_i32_13 = arith.constant 0 : i32
    %20 = arith.cmpi ne, %19, %c0_i32_13 : i32
    scf.if %20 {
      %c0_14 = arith.constant 0 : index
      %c0_15 = arith.constant 0 : index
      %21 = vector.load %arg5[%c0_14, %c0_15] : memref<128x128xf32, #tpu.memory_space<vmem>>, vector<128x128xf32>
      tpu.vector_store %arg5[%c0_14, %c0_15], %14 {strides = array<i32>} : memref<128x128xf32, #tpu.memory_space<vmem>>, vector<128x128xf32>,
    } else {
    }
    return
  }
  func.func @transform_0(%arg0: i32) -> (i32, i32) {
    %c0_i32 = arith.constant 0 : i32
    %c0_i32_0 = arith.constant 0 : i32
    %c0_i32_1 = arith.constant 0 : i32
    return %c0_i32, %c0_i32_0 : i32, i32
  }
  func.func @transform_1(%arg0: i32) -> (i32, i32) {
    %c0_i32 = arith.constant 0 : i32
    %c0_i32_0 = arith.constant 0 : i32
    %c0_i32_1 = arith.constant 0 : i32
    return %c0_i32, %c0_i32_0 : i32, i32
  }
  func.func @transform_2(%arg0: i32) -> (i32, i32, i32) {
    %c0_i32 = arith.constant 0 : i32
    %c0_i32_0 = arith.constant 0 : i32
    %c0_i32_1 = arith.constant 0 : i32
    return %arg0, %c0_i32, %c0_i32_0 : i32, i32, i32
  }
  func.func @transform_3(%arg0: i32) -> (i32, i32, i32) {
    %c0_i32 = arith.constant 0 : i32
    %c0_i32_0 = arith.constant 0 : i32
    %c0_i32_1 = arith.constant 0 : i32
    return %arg0, %c0_i32, %c0_i32_0 : i32, i32, i32
  }
  func.func @transform_4(%arg0: i32) -> (i32, i32) {
    %c0_i32 = arith.constant 0 : i32
    %c0_i32_0 = arith.constant 0 : i32
    %c0_i32_1 = arith.constant 0 : i32
    return %c0_i32, %c0_i32_0 : i32, i32
  }
}

</mosaic_0001>

<bundles_post_ra>
// kernel: tpu_custom_call.1
= control target key start
LH: loop header
LB: loop body
LE: loop exit
PB: predicated region body
PF: predicated region fallthrough
CT: control target
= control target key end

     0   :  { %9 = vsyncpa [#allocation4], 0  ;;  %s1452_s0 = inlined_call_operand.hbm [shape: bf16[128,128], index: 0, kind: input, shape index: {}]   ;;  %s1453_s1 = inlined_call_operand.hbm [shape: f32[128,128], index: 1, kind: input, shape index: {}]   ;;  %s1454_s2 = inlined_call_operand.hbm [shape: bf16[6,128,128], index: 2, kind: input, shape index: {}]   ;;  %s1455_s3 = inlined_call_operand.vmem [shape: f32[6,1,128], index: 3, kind: input, shape index: {}]   ;;  %s1456_s4 = inlined_call_operand.hbm [shape: f32[128,128], index: 4, kind: output, shape index: {}]  }
   0x1   :  { %10 = vsyncpa [#allocation7], 0 }
   0x2   :  { %11 = vsyncpa [#allocation5], 0  ;;  %s1203_s15 = smov 0   ;;  %s1205_s16 = smov 0  }
   0x3   :  { %s1207_s17 = smov 0   ;;  %s1209_s18 = smov 0  }
   0x4 LB: > { %s1222_s19 = sadd.s32 4294967295, %s1166_s18   ;;  %s1225_s20 = sadd.s32 1, %s1166_s18   ;;  %s1166_s18 = sphi %s1209_s18, %s1477_s18   ;;  %s1162_s17 = sphi %s1207_s17, %s1476_s17   ;;  %s1158_s16 = sphi %s1205_s16, %s1475_s16   ;;  %s1154_s15 = sphi %s1203_s15, %s1474_s15  }
   0x5   : > { %s63_s21 = ssub.s32 %s1166_s18, %s1225_s20  ;;  %s66_s22 = sadd.s32 1, %s1162_s17 }
   0x6   : > { %p64_p0 = scmp.eq.s32.totalorder %s63_s21, 0  ;;  %p73_p1 = scmp.ne.s32.totalorder %s1162_s17, %s1158_s16 }
   0x7   : > { %p74_p2 = scmp.eq.s32.totalorder %s1166_s18, 0  ;;  %p79_p3 = scmp.ne.s32.totalorder %s1158_s16, %s1154_s15 }
   0x8   : > { %s1235_s23 = scalar_select %p64_p0, %s1162_s17, %s66_s22  }
   0x9   : > { %p1237_p4 = por %p74_p2, %p73_p1  ;;  %p1457_p5 = scmp.eq.s32.totalorder %s1222_s19, 0 }
   0xa   : > { %p787_p6 = scmp.ge.s32.totalorder %s1166_s18, 1  ;;  %p137_p7 = scmp.lt.s32.totalorder %s1166_s18, 7 }
   0xb   : > { %p1246_p8 = por %p1457_p5, %p79_p3  ;;  %s1168_s27 = smov [#allocation3]  }
   0xc   : > { %p1251_p10 = pnand %p787_p6, %p137_p7  ;;  %s149_s28 = sshll.u32 %s1168_s27, 4  ;;  %s150_s28 = int_to_ptr.vmem [resolvable:$true] %s149_s28 }
   0xd   : > { %s1462_s25 = scalar_select %p1246_p8, 1, 0 }
   0xe   : > { %s1463_s26 = scalar_select %p1251_p10, 1, 0 }
   0xf   : > { %p933_p11 = pneg %p1251_p10  ;;  %p946_p13 = scmp.lt.s32.totalorder %s1166_s18, 6 }
  0x10   : > { %s1008_s7 = scalar_lea.hbm %s1452_s0, 1024 }
  0x11   : > { %p1259_p12 = pnand %p933_p11, %p1457_p5  ;;  %p1266_p0 = pnand %p946_p13, %p1237_p4 }
  0x12   : > { %p1009_p1 = scmp.ne.s32.totalorder %s1452_s0, %s1008_s7  ;;  %p1015_p4 = scmp.lt.u32.totalorder %s1008_s7, %s1452_s0 }
  0x13   : > { %s1465_s30 = scalar_select %p1266_p0, 1, 0 }
  0x14   : > { %p1010_p2 = pneg %p1259_p12 }
  0x16   : > { %p1011_p3 = pnand %p1010_p2, %p1009_p1 }
  0x18   : > { %p1012_p6 = pneg %p1011_p3 }
  0x1a   : > { %p1017_p7 = pnand %p1015_p4, %p1012_p6 }
  0x1c   : > { %1020 = shalt.err (!%p1017_p7)
}
  0x1d   : > { %s1021_s12 = scalar_lea.vmem %s150_s28, 1024  ;;  %p1029_p5 = scmp.lt.s32.totalorder %s150_s28, %s150_s28 }
  0x1e   : > { %p1022_p11 = scmp.ne.s32.totalorder %s150_s28, %s1021_s12  ;;  %p1030_p8 = scmp.lt.s32.totalorder %s1021_s12, %s1021_s12 }
  0x20   : > { %p1024_p13 = pnand %p1022_p11, %p1010_p2  ;;  %p1031_p10 = por %p1030_p8, %p1029_p5 }
  0x22   : > { %p1025_p9 = pneg %p1024_p13 }
  0x24   : > { %p1032_p0 = pnand %p1031_p10, %p1025_p9 }
  0x26   : > { %1035 = shalt.err (!%p1032_p0)
}
  0x27   : > { %s1169_s13 = smov 64   ;;  %s1170_s14 = smov 4  }
  0x28   : > { %936 = dma.hbm_to_vmem [thread:$0]  (!%p1259_p12), %s1452_s0, 1024, %s150_s28, [#allocation4], %s1169_s13, %s1169_s13, %s1170_s14  }
  0x29   : > { %s1171_s22 = smov [#allocation6]   ;;  %s1036_s6 = scalar_lea.hbm %s1453_s1, 2048 }
  0x2a   : > { %s162_s24 = sshll.u32 %s1171_s22, 4  ;;  %p1037_p5 = scmp.ne.s32.totalorder %s1453_s1, %s1036_s6  ;;  %s163_s24 = int_to_ptr.vmem [resolvable:$true] %s162_s24 }
  0x2b   : > { %p1043_p10 = scmp.lt.u32.totalorder %s1036_s6, %s1453_s1 }
  0x2c   : > { %p1039_p8 = pnand %p1037_p5, %p1010_p2 }
  0x2e   : > { %p1040_p9 = pneg %p1039_p8 }
  0x30   : > { %p1045_p0 = pnand %p1043_p10, %p1040_p9 }
  0x32   : > { %1048 = shalt.err (!%p1045_p0)
}
  0x33   : > { %s1049_s28 = scalar_lea.vmem %s163_s24, 2048  ;;  %p1057_p4 = scmp.lt.s32.totalorder %s163_s24, %s163_s24 }
  0x34   : > { %p1050_p1 = scmp.ne.s32.totalorder %s163_s24, %s1049_s28  ;;  %p1058_p7 = scmp.lt.s32.totalorder %s1049_s28, %s1049_s28 }
  0x36   : > { %p1052_p3 = pnand %p1050_p1, %p1010_p2  ;;  %p1059_p11 = por %p1058_p7, %p1057_p4 }
  0x38   : > { %p1053_p6 = pneg %p1052_p3 }
  0x3a   : > { %p1060_p13 = pnand %p1059_p11, %p1053_p6 }
  0x3c   : > { %1063 = shalt.err (!%p1060_p13)
}
  0x3d   : > { %s1172_s11 = smov 128   ;;  %s1173_s12 = smov 8  }
  0x3e   : > { %939 = dma.hbm_to_vmem [thread:$0]  (!%p1259_p12), %s1453_s1, 2048, %s163_s24, [#allocation7], %s1172_s11, %s1172_s11, %s1173_s12  }
  0x3f   : > { %s176_s22 = sand.u32 1, %s1166_s18   ;;  %s178_s27 = sand.u32 1, %s1162_s17  }
  0x40   : > { %s791_s5 = sshll.u32 %s178_s27, 6  ;;  %s822_s6 = sshll.u32 %s1166_s18, 10 }
  0x41   : > { %s1321_s9 = scalar_lea.hbm %s1454_s2, %s822_s6  ;;  %s180_s10 = scalar_lea.vmem [#allocation8], %s791_s5 }
  0x42   : > { %s187_s28 = sshll.u32 %s180_s10, 4  ;;  %s1325_s29 = scalar_lea.sflag [#allocation4], %s176_s22  ;;  %s1323_s28 = int_to_ptr.vmem [resolvable:$true] %s187_s28 }
  0x43   : > { %s1064_s24 = scalar_lea.hbm %s1321_s9, 1024  ;;  %p1466_p2 = scmp.ne.s32.totalorder %s1465_s30, 0 }
  0x44   : > { %p1065_p12 = scmp.ne.s32.totalorder %s1321_s9, %s1064_s24  ;;  %s1069_s12 = scalar_lea.hbm %s1454_s2, 6144 }
  0x45   : > { %p1066_p5 = pneg %p1466_p2  ;;  %p1070_p10 = scmp.lt.u32.totalorder %s1321_s9, %s1454_s2 }
  0x46   : > { %p1071_p0 = scmp.lt.u32.totalorder %s1069_s12, %s1064_s24  ;;  %p1073_p3 = scmp.lt.u32.totalorder %s1064_s24, %s1321_s9 }
  0x47   : > { %p1067_p8 = pnand %p1066_p5, %p1065_p12 }
  0x48   : > { %p1072_p1 = por %p1071_p0, %p1070_p10 }
  0x49   : > { %p1068_p9 = pneg %p1067_p8 }
  0x4a   : > { %p1074_p6 = por %p1073_p3, %p1072_p1 }
  0x4c   : > { %p1075_p4 = pnand %p1074_p6, %p1068_p9 }
  0x4e   : > { %1078 = shalt.err (!%p1075_p4)
}
  0x4f   : > { %s1079_s22 = scalar_lea.vmem %s1323_s28, 1024  ;;  %s1174_s27 = smov [#allocation8]  }
  0x50   : > { %p1080_p7 = scmp.ne.s32.totalorder %s1323_s28, %s1079_s22  ;;  %s1084_s5 = sshll.u32 %s1174_s27, 4  ;;  %s1085_s5 = int_to_ptr.vmem [resolvable:$false] %s1084_s5 }
  0x51   : > { %s1086_s6 = scalar_lea.vmem %s1085_s5, 2048  ;;  %p1087_p12 = scmp.lt.s32.totalorder %s1323_s28, %s1085_s5 }
  0x52   : > { %p1082_p11 = pnand %p1080_p7, %p1066_p5  ;;  %p1088_p8 = scmp.lt.s32.totalorder %s1086_s6, %s1079_s22 }
  0x54   : > { %p1083_p13 = pneg %p1082_p11  ;;  %p1089_p10 = por %p1088_p8, %p1087_p12 }
  0x56   : > { %p1090_p0 = pnand %p1089_p10, %p1083_p13 }
  0x58   : > { %1093 = shalt.err (!%p1090_p0)
}
  0x59   : > { %943 = dma.hbm_to_vmem [thread:$0]  (!%p1466_p2), %s1321_s9, 1024, %s1323_s28, %s1325_s29, %s1169_s13, %s1169_s13, %s1170_s14  }
  0x5a   : > { %p1467_p5 = scmp.ne.s32.totalorder %s1463_s26, 0 }
  0x5b   : > { %p1468_p9 = scmp.eq.s32.totalorder (!%p1467_p5), %s1222_s19, 0 }
  0x5c   : > { %205 = sbr.rel (%p1467_p5) target bundleno = 681 (0x2a9), region = 36 }
  0x63   : > { %1137 = dma.done.wait (%p1468_p9), [#allocation4], 1024   ;;  %p1469_p1 = pmov %p1468_p9 }
  0x65   : > { %1139 = vsyncadd (%p1469_p1), [#allocation4], 4294966272  ;;  %p1470_p3 = pmov %p1469_p1 }
  0x66   : > { %p1471_p6 = pmov %p1469_p1 }
  0x67   : > { %1141 = dma.done.wait (%p1470_p3), [#allocation7], 2048  }
  0x68   : > { %1143 = vsyncadd (%p1471_p6), [#allocation7], 4294965248  ;;  %s215_s30 = sand.u32 1, %s1222_s19   ;;  %s217_s13 = sand.u32 1, %s1158_s16  }
  0x69   : > { %s797_s14 = sshll.u32 %s217_s13, 6  ;;  %s216_s26 = scalar_lea.sflag [#allocation4], %s215_s30 }
  0x6a   : > { %s1368_s7 = scalar_lea.vmem [#allocation8], %s797_s14  ;;  %p1472_p2 = scmp.ne.s32.totalorder %s1462_s25, 0 }
  0x6c   : > { %1145 = dma.done.wait (%p1472_p2), %s216_s26, 1024  }
  0x6d   : > { %1147 = vsyncadd (%p1472_p2), %s216_s26, 4294966272  ;;  %p242_p4 = scmp.lt.s32.totalorder %s1222_s19, 5  ;;  %p1473_p7 = scmp.ne.s32.totalorder %s1222_s19, 0 }
  0x6e   : > { %v250_v0 = vld [vmem:[#allocation6] sm:$0xff] (!%p1473_p7)  ;;  %v251_v1 = vld [vmem:[#allocation6 + $0x8] sm:$0xff] (!%p1473_p7)  ;;  %v252_v2 = vld [vmem:[#allocation6 + $0x10] sm:$0xff] (!%p1473_p7) }
  0x6f   : > { %s1376_s8 = scalar_select %p242_p4, %s1222_s19, 5 }
  0x70   : > { %249 = sbr.rel (%p1473_p7) target bundleno = 120 (0x78), region = 52  ;;  %266 = vst [vmem:[#allocation2] sm:$0xff] (!%p1473_p7), %v250_v0  ;;  %267 = vst [vmem:[#allocation2 + $0x8] sm:$0xff] (!%p1473_p7), %v251_v1  ;;  %v253_v3 = vld [vmem:[#allocation6 + $0x18] sm:$0xff] (!%p1473_p7)  ;;  %v254_v4 = vld [vmem:[#allocation6 + $0x20] sm:$0xff] (!%p1473_p7) }
  0x71   : > { %s244_s28 = scalar_lea.vmem %s1455_s3, %s1376_s8  ;;  %268 = vst [vmem:[#allocation2 + $0x10] sm:$0xff] (!%p1473_p7), %v252_v2  ;;  %v255_v5 = vld [vmem:[#allocation6 + $0x28] sm:$0xff] (!%p1473_p7)  ;;  %269 = vst [vmem:[#allocation2 + $0x18] sm:$0xff] (!%p1473_p7), %v253_v3  ;;  %v256_v6 = vld [vmem:[#allocation6 + $0x30] sm:$0xff] (!%p1473_p7) }
  0x72   : > { %270 = vst [vmem:[#allocation2 + $0x20] sm:$0xff] (!%p1473_p7), %v254_v4  ;;  %271 = vst [vmem:[#allocation2 + $0x28] sm:$0xff] (!%p1473_p7), %v255_v5  ;;  %v257_v7 = vld [vmem:[#allocation6 + $0x38] sm:$0xff] (!%p1473_p7)  ;;  %v258_v8 = vld [vmem:[#allocation6 + $0x40] sm:$0xff] (!%p1473_p7) }
  0x73   : > { %272 = vst [vmem:[#allocation2 + $0x30] sm:$0xff] (!%p1473_p7), %v256_v6  ;;  %273 = vst [vmem:[#allocation2 + $0x38] sm:$0xff] (!%p1473_p7), %v257_v7  ;;  %v259_v9 = vld [vmem:[#allocation6 + $0x48] sm:$0xff] (!%p1473_p7)  ;;  %v260_v10 = vld [vmem:[#allocation6 + $0x50] sm:$0xff] (!%p1473_p7) }
  0x74   : > { %274 = vst [vmem:[#allocation2 + $0x40] sm:$0xff] (!%p1473_p7), %v258_v8  ;;  %v261_v11 = vld [vmem:[#allocation6 + $0x58] sm:$0xff] (!%p1473_p7)  ;;  %275 = vst [vmem:[#allocation2 + $0x48] sm:$0xff] (!%p1473_p7), %v259_v9  ;;  %v262_v12 = vld [vmem:[#allocation6 + $0x60] sm:$0xff] (!%p1473_p7) }
  0x75   : > { %276 = vst [vmem:[#allocation2 + $0x50] sm:$0xff] (!%p1473_p7), %v260_v10  ;;  %277 = vst [vmem:[#allocation2 + $0x58] sm:$0xff] (!%p1473_p7), %v261_v11  ;;  %v263_v13 = vld [vmem:[#allocation6 + $0x68] sm:$0xff] (!%p1473_p7)  ;;  %v264_v14 = vld [vmem:[#allocation6 + $0x70] sm:$0xff] (!%p1473_p7) }
  0x76   : > { %278 = vst [vmem:[#allocation2 + $0x60] sm:$0xff] (!%p1473_p7), %v262_v12  ;;  %279 = vst [vmem:[#allocation2 + $0x68] sm:$0xff] (!%p1473_p7), %v263_v13  ;;  %v265_v15 = vld [vmem:[#allocation6 + $0x78] sm:$0xff] (!%p1473_p7) }
  0x77   : > { %280 = vst [vmem:[#allocation2 + $0x70] sm:$0xff] %v264_v14  ;;  %281 = vst [vmem:[#allocation2 + $0x78] sm:$0xff] %v265_v15 }
  0x78 PF: > { %v992_v16 = vld [vmem:[%s1368_s7] sm:$0xff]   ;;  %v993_v17 = vld [vmem:[%s1368_s7 + $0x8] sm:$0xff]   ;;  %v994_v18 = vld [vmem:[%s1368_s7 + $0x10] sm:$0xff]   ;;  %p816_p11 = scmp.eq.s32.totalorder %s1222_s19, 5 }
  0x79   : > { %855 = vmatprep.subr.bf16.mxu0 %v992_v16  ;;  %v995_v19 = vld [vmem:[%s1368_s7 + $0x18] sm:$0xff]   ;;  %v282_v20 = vld [vmem:[#allocation2] sm:$0xff]  ;;  %v283_v21 = vld [vmem:[#allocation2 + $0x8] sm:$0xff] }
  0x7a   : > { %856 = vmatpush3.bf16.msra.mxu0 %v992_v16  ;;  %v298_v22 = vpack.c.bf16 %v283_v21, %v282_v20  ;;  %v996_v23 = vld [vmem:[%s1368_s7 + $0x20] sm:$0xff]   ;;  %v997_v24 = vld [vmem:[%s1368_s7 + $0x28] sm:$0xff]   ;;  %v998_v25 = vld [vmem:[%s1368_s7 + $0x30] sm:$0xff]  }
  0x7b   : > { %857 = vmatprep.subr.bf16.mxu0 %v993_v17  ;;  %v999_v26 = vld [vmem:[%s1368_s7 + $0x38] sm:$0xff]   ;;  %v284_v27 = vld [vmem:[#allocation2 + $0x10] sm:$0xff]  ;;  %v286_v29 = vld [vmem:[#allocation2 + $0x20] sm:$0xff] }
  0x7c   : > { %871 = vmatprep.mubr.bf16.mxu0 %v298_v22  ;;  %v285_v28 = vld [vmem:[#allocation2 + $0x18] sm:$0xff]  ;;  %v287_v30 = vld [vmem:[#allocation2 + $0x28] sm:$0xff]  ;;  %v288_v33 = vld [vmem:[#allocation2 + $0x30] sm:$0xff] }
  0x7d   : > { %v299_v31 = vpack.c.bf16 %v285_v28, %v284_v27  ;;  %v300_v32 = vpack.c.bf16 %v287_v30, %v286_v29  ;;  %v289_v34 = vld [vmem:[#allocation2 + $0x38] sm:$0xff]  ;;  %v290_v35 = vld [vmem:[#allocation2 + $0x40] sm:$0xff]  ;;  %v291_v36 = vld [vmem:[#allocation2 + $0x48] sm:$0xff] }
  0x7e   : > { %858 = vmatpush3.bf16.msra.mxu0 %v993_v17  ;;  %v301_v37 = vpack.c.bf16 %v289_v34, %v288_v33  ;;  %v302_v38 = vpack.c.bf16 %v291_v36, %v290_v35  ;;  %v292_v39 = vld [vmem:[#allocation2 + $0x50] sm:$0xff]  ;;  %v293_v40 = vld [vmem:[#allocation2 + $0x58] sm:$0xff]  ;;  %v294_v41 = vld [vmem:[#allocation2 + $0x60] sm:$0xff] }
  0x7f   : > { %859 = vmatprep.subr.bf16.mxu0 %v994_v18  ;;  %v295_v42 = vld [vmem:[#allocation2 + $0x68] sm:$0xff]  ;;  %v303_v43 = vpack.c.bf16 %v293_v40, %v292_v39  ;;  %v296_v45 = vld [vmem:[#allocation2 + $0x70] sm:$0xff]  ;;  %v297_v46 = vld [vmem:[#allocation2 + $0x78] sm:$0xff] }
  0x80   : > { %v304_v44 = vpack.c.bf16 %v295_v42, %v294_v41  ;;  %v305_v47 = vpack.c.bf16 %v297_v46, %v296_v45  ;;  %v1000_v48 = vld [vmem:[#allocation3] sm:$0xff]   ;;  %v1001_v9 = vld [vmem:[#allocation3 + $0x8] sm:$0xff]   ;;  %v1002_v10 = vld [vmem:[#allocation3 + $0x10] sm:$0xff]  }
  0x81   : > { %903 = vmatprep.mubr.bf16.mxu1 %v1000_v48  ;;  %v1003_v11 = vld [vmem:[#allocation3 + $0x18] sm:$0xff]   ;;  %v1004_v12 = vld [vmem:[#allocation3 + $0x20] sm:$0xff]   ;;  %v1005_v13 = vld [vmem:[#allocation3 + $0x28] sm:$0xff]  }
  0x82   : > { %860 = vmatpush3.bf16.msra.mxu0 %v994_v18  ;;  %v1006_v14 = vld [vmem:[#allocation3 + $0x30] sm:$0xff]   ;;  %v1007_v15 = vld [vmem:[#allocation3 + $0x38] sm:$0xff]   ;;  %v807_v16 = vld [vmem:[%s244_s28] ss:$0 sm:$0xff] }
  0x83   : > { %861 = vmatprep.subr.bf16.mxu0 %v995_v19 }
  0x86   : > { %862 = vmatpush3.bf16.msra.mxu0 %v995_v19 }
  0x87   : > { %863 = vmatprep.subr.bf16.mxu0 %v996_v23 }
  0x8a   : > { %864 = vmatpush3.bf16.msra.mxu0 %v996_v23 }
  0x8b   : > { %865 = vmatprep.subr.bf16.mxu0 %v997_v24 }
  0x8e   : > { %866 = vmatpush3.bf16.msra.mxu0 %v997_v24 }
  0x8f   : > { %867 = vmatprep.subr.bf16.mxu0 %v998_v25 }
  0x92   : > { %868 = vmatpush3.bf16.msra.mxu0 %v998_v25 }
  0x93   : > { %869 = vmatprep.subr.bf16.mxu0 %v999_v26 }
  0x96   : > { %870 = vmatpush3.bf16.msra.mxu0 %v999_v26 }
  0x99   : > { %872 = vmatmul.mubr.bf16.vlgmr.msra.gmra.mrb[0].mxu0 %v299_v31 }
  0x9a   : > { %875 = vmatprep.mubr.bf16.mxu0 %v300_v32 }
  0xa1   : > { %876 = vmatmul.mubr.bf16.gmra.mrb[4].mxu0 %v301_v37 }
  0xa2   : > { %879 = vmatprep.mubr.bf16.mxu0 %v302_v38 }
  0xa9   : > { %880 = vmatmul.mubr.bf16.gmra.mrb[8].mxu0 %v303_v43 }
  0xaa   : > { %883 = vmatprep.mubr.bf16.mxu0 %v304_v44 }
  0xb1   : > { %884 = vmatmul.mubr.bf16.gmra.mrb[12].mxu0 %v305_v47 }
 0x16c   : > { %v873_v49 = vpop.f32.mrb[0].mxu0 }
 0x16d   : > { %v404_v50 = vpop.f32.mrb[1].mxu0 }
 0x16e   : > { %v874_v51 = vpop.f32.mrb[2].mxu0 }
 0x16f   : > { %v484_v52 = vpack.c.bf16 %v874_v51, %v873_v49  ;;  %v407_v53 = vpop.f32.mrb[3].mxu0 }
 0x170   : > { %v483_v54 = vpack.c.bf16 %v407_v53, %v404_v50 }
 0x172   : > { %887 = vmatprep.subr.bf16.mxu1 %v483_v54 }
 0x173   : > { %888 = vmatpush3.bf16.msra.mxu1 %v483_v54 }
 0x174   : > { %v877_v55 = vpop.f32.mrb[4].mxu0  ;;  %889 = vmatprep.subr.bf16.mxu1 %v484_v52 }
 0x175   : > { %v420_v56 = vpop.f32.mrb[5].mxu0 }
 0x176   : > { %v878_v57 = vpop.f32.mrb[6].mxu0 }
 0x177   : > { %v486_v58 = vpack.c.bf16 %v878_v57, %v877_v55  ;;  %v423_v59 = vpop.f32.mrb[7].mxu0  ;;  %890 = vmatpush3.bf16.msra.mxu1 %v484_v52 }
 0x178   : > { %v485_v60 = vpack.c.bf16 %v423_v59, %v420_v56 }
 0x17a   : > { %891 = vmatprep.subr.bf16.mxu1 %v485_v60 }
 0x17b   : > { %892 = vmatpush3.bf16.msra.mxu1 %v485_v60 }
 0x17c   : > { %v881_v61 = vpop.f32.mrb[8].mxu0  ;;  %893 = vmatprep.subr.bf16.mxu1 %v486_v58 }
 0x17d   : > { %v436_v62 = vpop.f32.mrb[9].mxu0 }
 0x17e   : > { %v882_v63 = vpop.f32.mrb[10].mxu0 }
 0x17f   : > { %v488_v0 = vpack.c.bf16 %v882_v63, %v881_v61  ;;  %v439_v1 = vpop.f32.mrb[11].mxu0  ;;  %894 = vmatpush3.bf16.msra.mxu1 %v486_v58 }
 0x180   : > { %v487_v2 = vpack.c.bf16 %v439_v1, %v436_v62 }
 0x182   : > { %895 = vmatprep.subr.bf16.mxu1 %v487_v2 }
 0x183   : > { %896 = vmatpush3.bf16.msra.mxu1 %v487_v2 }
 0x184   : > { %v885_v3 = vpop.f32.mrb[12].mxu0  ;;  %897 = vmatprep.subr.bf16.mxu1 %v488_v0 }
 0x185   : > { %v452_v4 = vpop.f32.mrb[13].mxu0 }
 0x186   : > { %v886_v5 = vpop.f32.mrb[14].mxu0 }
 0x187   : > { %v490_v6 = vpack.c.bf16 %v886_v5, %v885_v3  ;;  %v455_v7 = vpop.f32.mrb[15].mxu0  ;;  %898 = vmatpush3.bf16.msra.mxu1 %v488_v0 }
 0x188   : > { %v489_v8 = vpack.c.bf16 %v455_v7, %v452_v4 }
 0x18a   : > { %899 = vmatprep.subr.bf16.mxu1 %v489_v8 }
 0x18b   : > { %900 = vmatpush3.bf16.msra.mxu1 %v489_v8 }
 0x18c   : > { %901 = vmatprep.subr.bf16.mxu1 %v490_v6 }
 0x18f   : > { %902 = vmatpush3.bf16.msra.mxu1 %v490_v6 }
 0x192   : > { %904 = vmatmul.mubr.bf16.vlgmr.msra.gmra.mrb[0].mxu1 %v1001_v9 }
 0x193   : > { %907 = vmatprep.mubr.bf16.mxu1 %v1002_v10 }
 0x19a   : > { %908 = vmatmul.mubr.bf16.gmra.mrb[4].mxu1 %v1003_v11 }
 0x19b   : > { %911 = vmatprep.mubr.bf16.mxu1 %v1004_v12 }
 0x1a2   : > { %912 = vmatmul.mubr.bf16.gmra.mrb[8].mxu1 %v1005_v13 }
 0x1a3   : > { %915 = vmatprep.mubr.bf16.mxu1 %v1006_v14 }
 0x1aa   : > { %916 = vmatmul.mubr.bf16.gmra.mrb[12].mxu1 %v1007_v15 }
 0x265   : > { %v905_v17 = vpop.f32.mrb[0].mxu1 }
 0x266   : > { %v1397_v18 = vadd.f32 %v905_v17, %v807_v16  ;;  %v580_v19 = vpop.f32.mrb[1].mxu1 }
 0x267   : > { %v1399_v20 = vadd.f32 %v807_v16, %v580_v19  ;;  %v906_v21 = vpop.f32.mrb[2].mxu1 }
 0x268   : > { %v1401_v22 = vadd.f32 %v906_v21, %v807_v16  ;;  %v583_v23 = vpop.f32.mrb[3].mxu1  ;;  %v649_v51 = vmax.f32 (!%p816_p11), %v1397_v18, 0.0 }
 0x269   : > { %v584_v24 = vadd.f32 %v807_v16, %v583_v23  ;;  %v647_v49 = vmax.f32 (!%p816_p11), %v1399_v20, 0.0 }
 0x26a   : > { %v650_v52 = vmax.f32 (!%p816_p11), %v1401_v22, 0.0  ;;  %665 = vst [vmem:[#allocation2 + $0x10] sm:$0xff] (!%p816_p11), %v649_v51 }
 0x26b   : > { %v648_v50 = vmax.f32 (!%p816_p11), %v584_v24, 0.0  ;;  %663 = vst [vmem:[#allocation2] sm:$0xff] (!%p816_p11), %v647_v49 }
 0x26c   : > { %666 = vst [vmem:[#allocation2 + $0x18] sm:$0xff] (!%p816_p11), %v650_v52 }
 0x26d   : > { %v909_v25 = vpop.f32.mrb[4].mxu1  ;;  %664 = vst [vmem:[#allocation2 + $0x8] sm:$0xff] (!%p816_p11), %v648_v50 }
 0x26e   : > { %v1403_v26 = vadd.f32 %v909_v25, %v807_v16  ;;  %v596_v27 = vpop.f32.mrb[5].mxu1 }
 0x26f   : > { %v597_v28 = vadd.f32 %v807_v16, %v596_v27  ;;  %v910_v29 = vpop.f32.mrb[6].mxu1 }
 0x270   : > { %v608_v30 = vadd.f32 %v910_v29, %v807_v16  ;;  %v599_v31 = vpop.f32.mrb[7].mxu1  ;;  %v653_v55 = vmax.f32 (!%p816_p11), %v1403_v26, 0.0 }
 0x271   : > { %v600_v32 = vadd.f32 %v807_v16, %v599_v31  ;;  %v651_v53 = vmax.f32 (!%p816_p11), %v597_v28, 0.0 }
 0x272   : > { %v654_v56 = vmax.f32 (!%p816_p11), %v608_v30, 0.0  ;;  %669 = vst [vmem:[#allocation2 + $0x30] sm:$0xff] (!%p816_p11), %v653_v55 }
 0x273   : > { %v652_v54 = vmax.f32 (!%p816_p11), %v600_v32, 0.0  ;;  %667 = vst [vmem:[#allocation2 + $0x20] sm:$0xff] (!%p816_p11), %v651_v53 }
 0x274   : > { %670 = vst [vmem:[#allocation2 + $0x38] sm:$0xff] (!%p816_p11), %v654_v56 }
 0x275   : > { %v913_v33 = vpop.f32.mrb[8].mxu1  ;;  %668 = vst [vmem:[#allocation2 + $0x28] sm:$0xff] (!%p816_p11), %v652_v54 }
 0x276   : > { %v621_v34 = vadd.f32 %v913_v33, %v807_v16  ;;  %v612_v35 = vpop.f32.mrb[9].mxu1 }
 0x277   : > { %v613_v36 = vadd.f32 %v807_v16, %v612_v35  ;;  %v914_v37 = vpop.f32.mrb[10].mxu1 }
 0x278   : > { %v624_v38 = vadd.f32 %v914_v37, %v807_v16  ;;  %v615_v39 = vpop.f32.mrb[11].mxu1  ;;  %v657_v59 = vmax.f32 (!%p816_p11), %v621_v34, 0.0 }
 0x279   : > { %v616_v40 = vadd.f32 %v807_v16, %v615_v39  ;;  %v655_v57 = vmax.f32 (!%p816_p11), %v613_v36, 0.0 }
 0x27a   : > { %v658_v60 = vmax.f32 (!%p816_p11), %v624_v38, 0.0  ;;  %673 = vst [vmem:[#allocation2 + $0x50] sm:$0xff] (!%p816_p11), %v657_v59 }
 0x27b   : > { %646 = sbr.rel (%p816_p11) target bundleno = 646 (0x286), region = 56  ;;  %v656_v58 = vmax.f32 (!%p816_p11), %v616_v40, 0.0  ;;  %671 = vst [vmem:[#allocation2 + $0x40] sm:$0xff] (!%p816_p11), %v655_v57 }
 0x27c   : > { %674 = vst [vmem:[#allocation2 + $0x58] sm:$0xff] (!%p816_p11), %v658_v60 }
 0x27d   : > { %v917_v41 = vpop.f32.mrb[12].mxu1  ;;  %672 = vst [vmem:[#allocation2 + $0x48] sm:$0xff] (!%p816_p11), %v656_v58 }
 0x27e   : > { %v637_v42 = vadd.f32 %v917_v41, %v807_v16  ;;  %v628_v43 = vpop.f32.mrb[13].mxu1 }
 0x27f   : > { %v629_v44 = vadd.f32 %v807_v16, %v628_v43  ;;  %v918_v45 = vpop.f32.mrb[14].mxu1 }
 0x280   : > { %v640_v46 = vadd.f32 %v918_v45, %v807_v16  ;;  %v631_v47 = vpop.f32.mrb[15].mxu1  ;;  %v661_v63 = vmax.f32 (!%p816_p11), %v637_v42, 0.0 }
 0x281   : > { %v632_v48 = vadd.f32 %v807_v16, %v631_v47  ;;  %v659_v61 = vmax.f32 (!%p816_p11), %v629_v44, 0.0 }
 0x282   : > { %v662_v0 = vmax.f32 %v640_v46, 0.0  ;;  %677 = vst [vmem:[#allocation2 + $0x70] sm:$0xff] %v661_v63 }
 0x283   : > { %v660_v62 = vmax.f32 %v632_v48, 0.0  ;;  %675 = vst [vmem:[#allocation2 + $0x60] sm:$0xff] %v659_v61 }
 0x284   : > { %678 = vst [vmem:[#allocation2 + $0x78] sm:$0xff] %v662_v0 }
 0x285   : > { %676 = vst [vmem:[#allocation2 + $0x68] sm:$0xff] %v660_v62 }
 0x286 PF: > { %p817_p13 = scmp.ne.s32.totalorder %s1222_s19, 5 }
 0x287   : > { %683 = vst [vmem:[#allocation9] sm:$0xff] (!%p817_p13), %v1399_v20  ;;  %684 = vst [vmem:[#allocation9 + $0x8] sm:$0xff] (!%p817_p13), %v584_v24 }
 0x288   : > { %682 = sbr.rel (%p817_p13) target bundleno = 655 (0x28f), region = 60  ;;  %685 = vst [vmem:[#allocation9 + $0x10] sm:$0xff] (!%p817_p13), %v1397_v18  ;;  %686 = vst [vmem:[#allocation9 + $0x18] sm:$0xff] (!%p817_p13), %v1401_v22 }
 0x289   : > { %687 = vst [vmem:[#allocation9 + $0x20] sm:$0xff] (!%p817_p13), %v597_v28  ;;  %688 = vst [vmem:[#allocation9 + $0x28] sm:$0xff] (!%p817_p13), %v600_v32 }
 0x28a   : > { %689 = vst [vmem:[#allocation9 + $0x30] sm:$0xff] (!%p817_p13), %v1403_v26  ;;  %690 = vst [vmem:[#allocation9 + $0x38] sm:$0xff] (!%p817_p13), %v608_v30 }
 0x28b   : > { %691 = vst [vmem:[#allocation9 + $0x40] sm:$0xff] (!%p817_p13), %v613_v36  ;;  %692 = vst [vmem:[#allocation9 + $0x48] sm:$0xff] (!%p817_p13), %v616_v40 }
 0x28c   : > { %693 = vst [vmem:[#allocation9 + $0x50] sm:$0xff] (!%p817_p13), %v621_v34  ;;  %694 = vst [vmem:[#allocation9 + $0x58] sm:$0xff] (!%p817_p13), %v624_v38 }
 0x28d   : > { %695 = vst [vmem:[#allocation9 + $0x60] sm:$0xff] (!%p817_p13), %v629_v44  ;;  %696 = vst [vmem:[#allocation9 + $0x68] sm:$0xff] (!%p817_p13), %v632_v48 }
 0x28e   : > { %697 = vst [vmem:[#allocation9 + $0x70] sm:$0xff] (!%p817_p13), %v637_v42  ;;  %698 = vst [vmem:[#allocation9 + $0x78] sm:$0xff] (!%p817_p13), %v640_v46 }
 0x28f PF: > { %s1175_s24 = smov [#allocation9]  }
 0x290   : > { %s705_s18 = sshll.u32 %s1175_s24, 4  ;;  %s706_s18 = int_to_ptr.vmem [resolvable:$true] %s705_s18 }
 0x291   : > { %s1094_s11 = scalar_lea.vmem %s706_s18, 2048  ;;  %p1101_p0 = scmp.lt.s32.totalorder %s706_s18, %s706_s18 }
 0x292   : > { %p1095_p12 = scmp.ne.s32.totalorder %s706_s18, %s1094_s11  ;;  %p1102_p5 = scmp.lt.s32.totalorder %s1094_s11, %s1094_s11 }
 0x294   : > { %p1096_p8 = pnand %p1095_p12, %p816_p11  ;;  %p1103_p9 = por %p1102_p5, %p1101_p0 }
 0x296   : > { %p1097_p10 = pneg %p1096_p8 }
 0x298   : > { %p1104_p1 = pnand %p1103_p9, %p1097_p10 }
 0x29a   : > { %1107 = shalt.err (!%p1104_p1)
}
 0x29b   : > { %s1108_s21 = scalar_lea.hbm %s1456_s4, 2048 }
 0x29c   : > { %p1109_p3 = scmp.ne.s32.totalorder %s1456_s4, %s1108_s21  ;;  %p1114_p4 = scmp.lt.u32.totalorder %s1108_s21, %s1456_s4 }
 0x29e   : > { %p1110_p6 = pnand %p1109_p3, %p816_p11 }
 0x2a0   : > { %p1111_p2 = pneg %p1110_p6 }
 0x2a2   : > { %p1116_p7 = pnand %p1114_p4, %p1111_p2 }
 0x2a4   : > { %1119 = shalt.err (!%p1116_p7)
}
 0x2a5   : > { %s1176_s30 = smov 128   ;;  %s1177_s13 = smov 8  }
 0x2a6   : > { %930 = dma.vmem_to_hbm [thread:$0]  (%p816_p11), %s706_s18, 2048, %s1456_s4, [#allocation5], %s1176_s30, %s1176_s30, %s1177_s13  }
 0x2a7   : > { %1149 = dma.done.wait (%p816_p11), [#allocation5], 2048  }
 0x2a8   : > { %1151 = vsyncadd (%p816_p11), [#allocation5], 4294965248 }
 0x2a9 PF: > { %p14_p13 = scmp.ge.s32.totalorder %s1225_s20, 8   ;;  %s1474_s15 = smov %s1158_s16 }
 0x2aa   : > { %s1475_s16 = smov %s1162_s17  ;;  %s1476_s17 = smov %s1235_s23 }
 0x2ab   : > { %s1477_s18 = smov %s1225_s20  ;;  %16 = sbr.rel (!%p14_p13) target bundleno = 4 (0x4), region = 95 }
 0x2b2   :  { %721 = vsyncpa [#allocation4], 1 }
 0x2b3   :  { %723 = vsyncpa [#allocation4 + $0x1], 1 }
 0x2b4   :  { %724 = vsyncpa [#allocation7], 1 }
 0x2b5   :  { %725 = vsyncpa [#allocation5], 1 }
 0x2b6   :  { %727 = vsyncpa [#allocation5 + $0x1], 1 }

</bundles_post_ra>
